<compile_context>
chip_gen: v7x
topology: tpu7x:2x2x1
jax: 0.10.0
libtpu: 0.0.40
codegen_flags: <defaults>
</compile_context>

<pallas_src>
import functools

import numpy as np
import jax
import jax.numpy as jnp
from jax.experimental import pallas as pl
from jax.experimental.pallas import tpu as pltpu


# ----------------------------------------------------------------------------
# Pallas kernel: fused 1x1 projection + separable bicubic resize.
# One grid step processes NB batch elements packed along the lane axis.
# ----------------------------------------------------------------------------

def _upsample_project_kernel(x_ref, w_ref, ry_ref, rxtb_ref, b_ref, o_ref):
    """x_ref   : (1, C, H, NB*W)   NB images, batch folded into the lane axis
       w_ref   : (C, 1)            1x1-conv (projection) weights
       ry_ref  : (TH, H)           row (height) bicubic matrix
       rxtb_ref: (NB*W, NB*TW)     block-diag column bicubic matrix, transposed
       b_ref   : (1,)   [SMEM]     projection bias
       o_ref   : (1, TH, NB*TW)    NB single-channel output planes
    """
    x = x_ref[0]                                              # (C, H, NB*W)
    w = w_ref[...]                                            # (C, 1)

    # 1x1 projection first (channel reduction).  The projection and the
    # bicubic resize are both linear, so the order swap is exact up to float
    # reassociation.  VPU weighted sum: C*H*(NB*W) MACs.
    z = jnp.sum(w[:, :, None] * x, axis=0)                    # (H, NB*W)

    # Separable bicubic resize: rows then columns (all NB images at once;
    # the column matrix is block-diagonal so images don't mix).
    q = jnp.dot(ry_ref[...], z, preferred_element_type=jnp.float32)       # (TH, NB*W)
    y = jnp.dot(q, rxtb_ref[...], preferred_element_type=jnp.float32)     # (TH, NB*TW)

    o_ref[...] = (y + b_ref[0])[None, :, :]


# ----------------------------------------------------------------------------
# Bicubic interpolation matrix (PyTorch F.interpolate 'bicubic',
# align_corners=False, antialias=False), built on host in numpy.
# ----------------------------------------------------------------------------

def _bicubic_matrix_np(in_size, out_size):
    A = -0.75

    def k1(t):  # |t| <= 1
        return ((A + 2.0) * t - (A + 3.0)) * t * t + 1.0

    def k2(t):  # 1 < |t| < 2
        return A * (((t - 5.0) * t + 8.0) * t - 4.0)

    m = np.zeros((out_size, in_size), dtype=np.float32)
    scale = in_size / out_size
    for i in range(out_size):
        real = (i + 0.5) * scale - 0.5
        idx = int(np.floor(real))
        t = real - idx
        ws = (k2(t + 1.0), k1(t), k1(1.0 - t), k2(2.0 - t))
        for off in range(4):
            j = min(max(idx - 1 + off, 0), in_size - 1)
            m[i, j] += ws[off]
    return m


# ----------------------------------------------------------------------------
# Forward wrapper
# ----------------------------------------------------------------------------

@functools.partial(jax.jit, static_argnums=(3, 4))
def final_upsampler_and_projection(x, conv_w, conv_b, target_h, target_w):
    """x: (N, C, H, W) float32; conv_w: (1, C, 1, 1); conv_b: (1,) or None.
    Returns (N, 1, target_h, target_w)."""
    N, C, H, W = x.shape
    TH, TW = target_h, target_w

    # Images per grid step: amortizes the ~0.35 us per-step pipeline overhead
    # and widens the lane (minor) dimension of the x/out blocks.
    NB = max(1, min(N, 8))
    G = -(-N // NB)                 # ceil(N / NB) grid steps
    Np = G * NB

    w_proj = conv_w.reshape(C, 1).astype(jnp.float32)          # (C, 1)
    if conv_b is None:
        bias = jnp.zeros((1,), jnp.float32)
    else:
        bias = conv_b.reshape(1).astype(jnp.float32)           # (1,)

    # Host-built (trace-time constant) interpolation matrices.
    ry = jnp.asarray(_bicubic_matrix_np(H, TH))                # (TH, H)
    rxt_np = _bicubic_matrix_np(W, TW).T                       # (W, TW)
    # Block-diagonal column matrix so all NB images resize in one MXU matmul
    # without in-kernel lane slicing (wastes NBx MXU MACs on zeros, which is
    # irrelevant: the kernel is overhead / bandwidth bound at these sizes).
    rxtb = jnp.asarray(np.kron(np.eye(NB, dtype=np.float32), rxt_np))  # (NB*W, NB*TW)

    # (N, C, H, W) -> pad batch -> (G, C, H, NB*W) with batch on the lane axis.
    xf = x.astype(jnp.float32)
    if Np != N:
        xf = jnp.pad(xf, ((0, Np - N), (0, 0), (0, 0), (0, 0)))
    xk = jnp.transpose(xf.reshape(G, NB, C, H, W), (0, 2, 3, 1, 4))
    xk = xk.reshape(G, C, H, NB * W)

    # VMEM budget from actual block sizes: double-buffered x/out blocks plus
    # single-buffered weights, with ~2x headroom (floor 4 MiB, cap 96 MiB).
    blk_bytes = 4 * (C * H * NB * W + TH * NB * TW)
    wt_bytes = 4 * (TH * H + (NB * W) * (NB * TW) + C)
    vmem_limit = int(min(96 * 2**20, max(4 * 2**20, 2 * (2 * blk_bytes + wt_bytes))))

    out = pl.pallas_call(
        _upsample_project_kernel,
        out_shape=jax.ShapeDtypeStruct((G, TH, NB * TW), jnp.float32),
        grid=(G,),
        in_specs=[
            pl.BlockSpec((1, C, H, NB * W), lambda g: (g, 0, 0, 0)),
            # Grid-invariant weights: single-buffered (no useless 2nd buffer).
            pl.BlockSpec((C, 1), lambda g: (0, 0),
                         pipeline_mode=pl.Buffered(1)),
            pl.BlockSpec((TH, H), lambda g: (0, 0),
                         pipeline_mode=pl.Buffered(1)),
            pl.BlockSpec((NB * W, NB * TW), lambda g: (0, 0),
                         pipeline_mode=pl.Buffered(1)),
            pl.BlockSpec(memory_space=pltpu.MemorySpace.SMEM),
        ],
        out_specs=pl.BlockSpec((1, TH, NB * TW), lambda g: (g, 0, 0)),
        compiler_params=pltpu.CompilerParams(
            dimension_semantics=("parallel",),
            vmem_limit_bytes=vmem_limit,
        ),
    )(xk, w_proj, ry, rxtb, bias)

    # (G, TH, NB*TW) -> (N, 1, TH, TW): de-interleave batch from the lane axis.
    out = out.reshape(G, TH, NB, TW)
    out = jnp.transpose(out, (0, 2, 1, 3)).reshape(Np, TH, TW)
    return out[:N].reshape(N, 1, TH, TW)


# ----------------------------------------------------------------------------

if __name__ == "__main__":
    N, C, H, W = 2, 4, 16, 16
    TARGET_H, TARGET_W = 32, 32

    key = jax.random.PRNGKey(0)
    kx, kw, kb = jax.random.split(key, 3)
    x = jax.random.normal(kx, (N, C, H, W), jnp.float32)
    conv_w = jax.random.normal(kw, (1, C, 1, 1), jnp.float32) / np.sqrt(C)
    conv_b = 0.05 * jax.random.normal(kb, (1,), jnp.float32)

    out = final_upsampler_and_projection(x, conv_w, conv_b, TARGET_H, TARGET_W)
    out = jax.block_until_ready(out)

    assert out.shape == (N, 1, TARGET_H, TARGET_W), out.shape
    assert bool(jnp.all(jnp.isfinite(out)))

    # Plain-JAX reference using the literal op order of the module
    # (bicubic interpolate each channel, then 1x1 projection + bias).
    ry = jnp.asarray(_bicubic_matrix_np(H, TARGET_H))          # (TH, H)
    rx = jnp.asarray(_bicubic_matrix_np(W, TARGET_W))          # (TW, W)
    hi = jax.lax.Precision.HIGHEST
    up = jnp.einsum('th,nchw->nctw', ry, x, precision=hi)
    up = jnp.einsum('sw,nctw->ncts', rx, up, precision=hi)
    ref = jnp.einsum('c,ncts->nts', conv_w.reshape(C), up, precision=hi)
    ref = ref[:, None, :, :] + conv_b.reshape(1, 1, 1, 1)
    err = float(jnp.max(jnp.abs(out - ref)))
    assert bool(jnp.allclose(out, ref, atol=2e-4, rtol=2e-4)), err

    print("KERNEL_OK")
</pallas_src>

<mosaic_0001>
module attributes {stable_mosaic.version = 11 : i64} {
  func.func @_upsample_project_kernel(%arg0: i32, %arg1: memref<1x4x16x32xf32, #tpu.memory_space<vmem>>, %arg2: memref<4x1xf32, #tpu.memory_space<vmem>>, %arg3: memref<32x16xf32, #tpu.memory_space<vmem>>, %arg4: memref<32x64xf32, #tpu.memory_space<vmem>>, %arg5: memref<1xf32, #tpu.memory_space<smem>>, %arg6: memref<1x32x64xf32, #tpu.memory_space<vmem>>) attributes {dimension_semantics = [#tpu.dimension_semantics<parallel>], iteration_bounds = array<i64: 1>, scalar_prefetch = 0 : i64, scratch_operands = 0 : i64, tpu.core_type = #tpu.core_type<tc>, window_params = [{transform_indices = @transform_0, window_bounds = array<i64: 1, 4, 16, 32>}, {pipeline_mode = #tpu.pipeline_mode<synchronous>, transform_indices = @transform_1, window_bounds = array<i64: 4, 1>}, {pipeline_mode = #tpu.pipeline_mode<synchronous>, transform_indices = @transform_2, window_bounds = array<i64: 32, 16>}, {pipeline_mode = #tpu.pipeline_mode<synchronous>, transform_indices = @transform_3, window_bounds = array<i64: 32, 64>}, {transform_indices = @transform_4, window_bounds = array<i64: 1>}, {transform_indices = @transform_5, window_bounds = array<i64: 1, 32, 64>}]} {
    %c0 = arith.constant 0 : index
    %c0_0 = arith.constant 0 : index
    %c0_1 = arith.constant 0 : index
    %c0_2 = arith.constant 0 : index
    %0 = vector.load %arg1[%c0, %c0_0, %c0_1, %c0_2] : memref<1x4x16x32xf32, #tpu.memory_space<vmem>>, vector<1x4x16x32xf32>
    %1 = vector.shape_cast %0 : vector<1x4x16x32xf32> to vector<4x16x32xf32>
    %c0_3 = arith.constant 0 : index
    %c0_4 = arith.constant 0 : index
    %2 = vector.load %arg2[%c0_3, %c0_4] : memref<4x1xf32, #tpu.memory_space<vmem>>, vector<4x1xf32>
    %3 = vector.shape_cast %2 : vector<4x1xf32> to vector<4x1x1xf32>
    %4 = vector.broadcast %3 : vector<4x1x1xf32> to vector<4x16x32xf32>
    %5 = arith.mulf %4, %1 : vector<4x16x32xf32>
    %cst = arith.constant dense<0.000000e+00> : vector<16x32xf32>
    %6 = vector.multi_reduction <add>, %5, %cst [0] : vector<4x16x32xf32> to vector<16x32xf32>
    %c0_5 = arith.constant 0 : index
    %c0_6 = arith.constant 0 : index
    %7 = vector.load %arg3[%c0_5, %c0_6] : memref<32x16xf32, #tpu.memory_space<vmem>>, vector<32x16xf32>
    %cst_7 = arith.constant dense<0.000000e+00> : vector<32x32xf32>
    %8 = tpu.matmul %7, %6, %cst_7 {dimension_numbers = #tpu.dot_dimension_numbers<[1], [0], [0], [1], [0, 0, 1, 1], [], []>} : vector<32x16xf32>, vector<16x32xf32>, vector<32x32xf32> -> vector<32x32xf32>
    %c0_8 = arith.constant 0 : index
    %c0_9 = arith.constant 0 : index
    %9 = vector.load %arg4[%c0_8, %c0_9] : memref<32x64xf32, #tpu.memory_space<vmem>>, vector<32x64xf32>
    %cst_10 = arith.constant dense<0.000000e+00> : vector<32x64xf32>
    %10 = tpu.matmul %8, %9, %cst_10 {dimension_numbers = #tpu.dot_dimension_numbers<[1], [0], [0], [1], [0, 0, 1, 1], [], []>} : vector<32x32xf32>, vector<32x64xf32>, vector<32x64xf32> -> vector<32x64xf32>
    %c0_11 = arith.constant 0 : index
    %11 = memref.load %arg5[%c0_11] : memref<1xf32, #tpu.memory_space<smem>>
    %12 = vector.broadcast %11 : f32 to vector<32x64xf32>
    %13 = arith.addf %10, %12 : vector<32x64xf32>
    %14 = vector.shape_cast %13 : vector<32x64xf32> to vector<1x32x64xf32>
    %c0_12 = arith.constant 0 : index
    %c0_13 = arith.constant 0 : index
    %c0_14 = arith.constant 0 : index
    %15 = vector.load %arg6[%c0_12, %c0_13, %c0_14] : memref<1x32x64xf32, #tpu.memory_space<vmem>>, vector<1x32x64xf32>
    tpu.vector_store %arg6[%c0_12, %c0_13, %c0_14], %14 {strides = array<i32>} : memref<1x32x64xf32, #tpu.memory_space<vmem>>, vector<1x32x64xf32>,
    return
  }
  func.func @transform_0(%arg0: i32) -> (i32, i32, i32, i32) {
    %c0_i32 = arith.constant 0 : i32
    %c0_i32_0 = arith.constant 0 : i32
    %c0_i32_1 = arith.constant 0 : i32
    %c0_i32_2 = arith.constant 0 : i32
    return %arg0, %c0_i32, %c0_i32_0, %c0_i32_1 : i32, i32, i32, i32
  }
  func.func @transform_1(%arg0: i32) -> (i32, i32) {
    %c0_i32 = arith.constant 0 : i32
    %c0_i32_0 = arith.constant 0 : i32
    %c0_i32_1 = arith.constant 0 : i32
    return %c0_i32, %c0_i32_0 : i32, i32
  }
  func.func @transform_2(%arg0: i32) -> (i32, i32) {
    %c0_i32 = arith.constant 0 : i32
    %c0_i32_0 = arith.constant 0 : i32
    %c0_i32_1 = arith.constant 0 : i32
    return %c0_i32, %c0_i32_0 : i32, i32
  }
  func.func @transform_3(%arg0: i32) -> (i32, i32) {
    %c0_i32 = arith.constant 0 : i32
    %c0_i32_0 = arith.constant 0 : i32
    %c0_i32_1 = arith.constant 0 : i32
    return %c0_i32, %c0_i32_0 : i32, i32
  }
  func.func @transform_4(%arg0: i32) -> i32 {
    %c0_i32 = arith.constant 0 : i32
    %c0_i32_0 = arith.constant 0 : i32
    return %c0_i32 : i32
  }
  func.func @transform_5(%arg0: i32) -> (i32, i32, i32) {
    %c0_i32 = arith.constant 0 : i32
    %c0_i32_0 = arith.constant 0 : i32
    %c0_i32_1 = arith.constant 0 : i32
    return %arg0, %c0_i32, %c0_i32_0 : i32, i32, i32
  }
}

</mosaic_0001>

<bundles_post_ra>
// kernel: final_upsampler_and_projection.1
= control target key start
LH: loop header
LB: loop body
LE: loop exit
PB: predicated region body
PF: predicated region fallthrough
CT: control target
= control target key end

     0   :  { %v42_v0 = vlaneseq  ;;  %v387_v1 = vmov 0   ;;  %v388_v2 = vmov 1966171168   ;;  %vm114_vm0 = vcmask 130048   ;;  %s501_s1 = inlined_call_operand.vmem [shape: f32[4,1], index: 1, kind: input, shape index: {}]   ;;  %s502_s2 = inlined_call_operand.vmem [shape: f32[32,16], index: 2, kind: input, shape index: {}]   ;;  %s503_s3 = inlined_call_operand.vmem [shape: f32[32,64], index: 3, kind: input, shape index: {}]   ;;  %s504_s0 = inlined_call_operand.vmem [shape: f32[1,4,16,32], index: 0, kind: input, shape index: {}]   ;;  %s505_s4 = inlined_call_operand.<no memory space> [shape: f32[1], index: 4, kind: input, shape index: {}]   ;;  %s506_s5 = inlined_call_operand.vmem [shape: f32[1,32,64], index: 5, kind: output, shape index: {}]  }
   0x1   :  { %385 = vset.pattern.permute.xlu0 %v387_v1  ;;  %v40_v3 = vunpack.c.l.s4 %v388_v2  ;;  %386 = vset.pattern.permute.xlu1 %v387_v1  ;;  %v324_v4 = vld.sshfl [vmem:[%s501_s1] sm:$0x33 pattern:$0x75316420]  ;;  %v213_v20 = vld [vmem:[%s503_s3 + $0x8] sm:$0xff]  ;;  %v214_v21 = vld [vmem:[%s503_s3 + $0x10] sm:$0xff] }
   0x2   :  { %v43_v5 = vshrl.u32 %v42_v0, 7  ;;  %v38_v7 = vcombine.high %v324_v4, %v324_v4  ;;  %v110_v18 = vld [vmem:[%s502_s2] sm:$0xff]  ;;  %v215_v23 = vld [vmem:[%s503_s3 + $0x18] sm:$0xff]  ;;  %v22_v26 = vld [vmem:[%s504_s0 + $0x8] sm:$0xff]  ;;  %vm95_vm1 = vcmask 261120   ;;  %vm315_vm2 = vcmask 523264  }
   0x3   :  { %v41_v6 = vunpack.c.0.s8 %v40_v3  ;;  %351 = vmatprep.mubr.msk.f32.mxu0 %vm114_vm0, %v110_v18  ;;  %v212_v19 = vld [vmem:[%s503_s3] sm:$0xff]  ;;  %v379_v24 = vpack.c.bf16 %v215_v23, %v214_v21  ;;  %v26_v32 = vld [vmem:[%s504_s0 + $0x28] sm:$0xff]  ;;  %v23_v33 = vld [vmem:[%s504_s0 + $0x10] sm:$0xff]  ;;  %v217_v3 = vstv %s505_s4 }
   0x4   :  { %v57_v9 = vsub.s32 0, %v43_v5  ;;  %v375_v22 = vpack.c.bf16 %v213_v20, %v212_v19  ;;  %v21_v25 = vld [vmem:[%s504_s0] sm:$0xff]  ;;  %v24_v34 = vld [vmem:[%s504_s0 + $0x18] sm:$0xff]  ;;  %v27_v36 = vld [vmem:[%s504_s0 + $0x30] sm:$0xff] }
   0x5   :  { %v44_v8 = vsub.s32 %v41_v6, %v43_v5  ;;  %v25_v28 = vld [vmem:[%s504_s0 + $0x20] sm:$0xff]  ;;  %v28_v37 = vld [vmem:[%s504_s0 + $0x38] sm:$0xff]  ;;  %v111_v60 = vld [vmem:[%s502_s2 + $0x8] sm:$0xff] }
   0x6   :  { %376 = vmatprep.subr.bf16.mxu1 %v375_v22  ;;  %v112_v61 = vld [vmem:[%s502_s2 + $0x10] sm:$0xff]  ;;  %v113_v62 = vld [vmem:[%s502_s2 + $0x18] sm:$0xff] }
   0x7   :  { %v45_v10 = vrot.slane %v324_v4, %v44_v8  ;;  %v52_v11 = vrot.slane %v38_v7, %v44_v8  ;;  %378 = vmatpush3.bf16.msra.mxu1 %v375_v22 }
   0x8   :  { %380 = vmatprep.subr.bf16.mxu1 %v379_v24 }
   0x9   :  { %v58_v12 = vrot.slane %v45_v10, %v57_v9  ;;  %v53_v13 = vcombine.high %v45_v10, %v45_v10  ;;  %v54_v14 = vcombine.high %v52_v11, %v52_v11  ;;  %v62_v16 = vrot.slane %v52_v11, %v57_v9 }
   0xb   :  { %72 = vperm.xlu0 %385, %v58_v12   ;;  %v66_v15 = vrot.slane %v53_v13, %v57_v9  ;;  %v70_v17 = vrot.slane %v54_v14, %v57_v9  ;;  %382 = vmatpush3.bf16.msra.mxu1 %v379_v24 }
   0xd   :  { %80 = vperm.xlu1 %386, %v66_v15  }
   0xf   :  { %76 = vperm.xlu0 %385, %v62_v16  }
  0x11   :  { %84 = vperm.xlu1 %386, %v70_v17  }
  0x8a   :  { %v73_v27 = vpop.permute.xlu0 %72 }
  0x8b   :  { %v87_v29 = vmul.f32 %v73_v27, %v21_v25  ;;  %v88_v30 = vmul.f32 %v73_v27, %v22_v26 }
  0x8c   :  { %v81_v31 = vpop.permute.xlu1 %80 }
  0x8d   :  { %v91_v38 = vmul.f32 %v81_v31, %v25_v28  ;;  %v92_v39 = vmul.f32 %v81_v31, %v26_v32  ;;  %v96_v42 = vsel %vm95_vm1, %v87_v29, 0.0  ;;  %v103_v43 = vsel %vm95_vm1, %v88_v30, 0.0 }
  0x8e   :  { %v77_v35 = vpop.permute.xlu0 %76 }
  0x8f   :  { %v89_v40 = vmul.f32 %v77_v35, %v23_v33  ;;  %v90_v41 = vmul.f32 %v77_v35, %v24_v34  ;;  %v99_v51 = vsel %vm95_vm1, %v91_v38, 0.0  ;;  %v106_v52 = vsel %vm95_vm1, %v92_v39, 0.0 }
  0x90   :  { %v85_v44 = vpop.permute.xlu1 %84 }
  0x91   :  { %v97_v45 = vsel %vm95_vm1, %v89_v40, 0.0  ;;  %v104_v46 = vsel %vm95_vm1, %v90_v41, 0.0  ;;  %v93_v47 = vmul.f32 %v85_v44, %v27_v36  ;;  %v94_v48 = vmul.f32 %v85_v44, %v28_v37 }
  0x92   :  { %v98_v49 = vadd.f32 %v97_v45, %v96_v42  ;;  %v105_v50 = vadd.f32 %v104_v46, %v103_v43 }
  0x93   :  { %v101_v55 = vsel %vm95_vm1, %v93_v47, 0.0  ;;  %v108_v56 = vsel %vm95_vm1, %v94_v48, 0.0 }
  0x94   :  { %v100_v53 = vadd.f32 %v99_v51, %v98_v49  ;;  %v107_v54 = vadd.f32 %v106_v52, %v105_v50 }
  0x96   :  { %v102_v57 = vadd.f32 %v101_v55, %v100_v53  ;;  %v109_v58 = vadd.f32 %v108_v56, %v107_v54 }
  0x98   :  { %v371_v59 = vpack.c.bf16 %v109_v58, %v102_v57 }
  0x9a   :  { %372 = vmatprep.subr.bf16.mxu0 %v371_v59 }
  0x9b   :  { %374 = vmatpush3.bf16.msra.mxu0 %v371_v59 }
  0x9e   :  { %352 = vmatmul.mubr.msk.f32.vlgmr.msra.gmra.mrb[0].mxu0 %vm114_vm0, %v111_v60 }
  0x9f   :  { %354 = vmatprep.mubr.msk.f32.mxu0 %vm114_vm0, %v112_v61 }
  0xa2   :  { %355 = vmatmul.mubr.msk.f32.gmra.mrb[2].mxu0 %vm114_vm0, %v113_v62 }
 0x171   :  { %v353_v63 = vpop.f32.mrb[0].mxu0 }
 0x172   :  { %v193_v0 = vpop.f32.mrb[1].mxu0 }
 0x173   :  { %365 = vmatprep.mubr.msk.f32.mxu1 %vm95_vm1, %v193_v0 }
 0x174   :  { %366 = vmatmul.mubr.msk.f32.vlgmr.msra.gmra.mrb[0].mxu1 %vm95_vm1, %v353_v63 }
 0x175   :  { %v356_v1 = vpop.f32.mrb[2].mxu0 }
 0x176   :  { %v203_v2 = vpop.f32.mrb[3].mxu0 }
 0x177   :  { %368 = vmatprep.mubr.msk.f32.mxu1 %vm95_vm1, %v203_v2 }
 0x178   :  { %369 = vmatmul.mubr.msk.f32.gmra.mrb[2].mxu1 %vm95_vm1, %v356_v1 }
 0x247   :  { %v367_v4 = vpop.f32.mrb[0].mxu1 }
 0x248   :  { %v302_v5 = vadd.f32 %v367_v4, %v217_v3  ;;  %v296_v6 = vpop.f32.mrb[1].mxu1 }
 0x249   :  { %v297_v7 = vadd.f32 %v296_v6, %v217_v3 }
 0x24a   :  { %317 = vst.msk [vmem:[%s506_s5 + $0x8] sm:$0xff] %vm315_vm2, %v302_v5 }
 0x24b   :  { %316 = vst.msk [vmem:[%s506_s5] sm:$0xff] %vm315_vm2, %v297_v7  ;;  %v370_v8 = vpop.f32.mrb[2].mxu1 }
 0x24c   :  { %v312_v9 = vadd.f32 %v370_v8, %v217_v3  ;;  %v306_v10 = vpop.f32.mrb[3].mxu1 }
 0x24d   :  { %v307_v11 = vadd.f32 %v306_v10, %v217_v3 }
 0x24e   :  { %319 = vst.msk [vmem:[%s506_s5 + $0x18] sm:$0xff] %vm315_vm2, %v312_v9 }
 0x24f   :  { %318 = vst.msk [vmem:[%s506_s5 + $0x10] sm:$0xff] %vm315_vm2, %v307_v11 }

</bundles_post_ra>
